<compile_context>
chip_gen: v5e
topology: v5e:2x2
jax: 0.10.0
libtpu: 0.0.40
codegen_flags: <defaults>
</compile_context>

<pallas_src>
import functools

import jax
import jax.numpy as jnp
from jax.experimental import pallas as pl
from jax.experimental.pallas import tpu as pltpu

_TILE_BUDGET_BYTES = 8 << 20   # ~8 MiB per input tile (2 MiB left ~35% of roofline
                               # to per-step overhead on v7x; 8 MiB -> ~90%).
_VMEM_LIMIT_BYTES = 40 << 20   # 2 x 8 MiB double-buffered input + <= 8 MiB f32 acc
                               # + output, with slack; safe on v5e/v6e (128 MiB) and
                               # a modest bump over v7x's 32 MiB default scope.


def _ave_pool_kernel(x_ref, o_ref, acc_ref, *, inv_n, n_total, tn, sub, g, d_out,
                     needs_mask):
    """x_ref: (tb, tn, td) input tile; o_ref: (tb, d_out) f32; acc_ref: (tb, sub, td) f32."""
    k = pl.program_id(2)

    @pl.when(k == 0)
    def _():
        acc_ref[...] = jnp.zeros_like(acc_ref)

    x = x_ref[...].astype(jnp.float32)            # native-width DMA, in-vreg upcast
    tb, _, td = x.shape

    if needs_mask:
        # cdiv grid on the reduction axis: zero rows past the true extent so the
        # out-of-bounds tail of the last tile cannot pollute the sum.
        row = jax.lax.broadcasted_iota(jnp.int32, (tb, tn, td), 1)
        x = jnp.where(row < (n_total - k * tn), x, 0.0)

    # Hot loop stays on the VPU: fold groups of `sub` consecutive sublanes with
    # elementwise vreg adds; the cross-sublane (XLU) reduce is deferred to the
    # epilogue instead of being paid every grid step.
    if tn == sub:
        acc_ref[...] += x
    else:
        acc_ref[...] += x.reshape(tb, tn // sub, sub, td).sum(axis=1)

    @pl.when(k == pl.num_programs(2) - 1)
    def _():
        partial = acc_ref[...].sum(axis=1)        # (tb, td): single sublane reduce
        if g > 1:
            # Undo the wrapper's lane packing: g original rows sit side by side
            # along the lane dim; fold them back to the true feature width.
            folded = partial[:, 0:d_out]
            for j in range(1, g):
                folded = folded + partial[:, j * d_out:(j + 1) * d_out]
            partial = folded
        o_ref[...] = (partial * inv_n).astype(o_ref.dtype)


def _divisor_tile(total, cap, align):
    """Largest multiple of `align` dividing `total` within [cap//2, cap], else None."""
    hi = (min(cap, total) // align) * align
    lo = max(align, hi // 2)
    t = hi
    while t >= lo:
        if total % t == 0:
            return t
        t -= align
    return None


def _choose_tiles(B, Np, Dp, itemsize, budget=_TILE_BUDGET_BYTES):
    """Pick (tb, td, tn, needs_mask) with a TN-first policy and ~budget-sized tiles."""
    n_align = max(8, 32 // max(1, itemsize))      # sublane packing: f32 8, bf16 16, int8 32

    # Small fixed batch tile.  Non-divisor B is fine: out-of-bounds rows of the last
    # block read garbage but their output writes are discarded by Pallas.
    tb = B if B <= 8 else 8
    grid_b = pl.cdiv(B, tb)

    # Feature tile: full Dp when it fits alongside one aligned N-group; otherwise a
    # multiple of 128 (divisor preferred, cdiv tail otherwise).  Also split Dp when
    # the batch grid collapses to one block so the second TensorCore (v7x) has work.
    if Dp <= 128:
        td = Dp
    else:
        cap = budget // max(1, tb * n_align * itemsize)
        if grid_b == 1 and Dp >= 256:
            cap = min(cap, Dp // 2)
        cap = max(128, (cap // 128) * 128)
        if Dp <= cap:
            td = Dp
        else:
            td = _divisor_tile(Dp, cap, 128) or cap

    # Reduction tile: fill the remaining budget.  Prefer an aligned divisor of Np
    # (no masking); otherwise take the aligned cap, use a cdiv grid, and mask the
    # ragged tail rows inside the kernel.  Never fall back to the full extent.
    needs_mask = False
    if Np <= n_align:
        tn = Np
    else:
        cap = max(n_align, budget // max(1, tb * td * itemsize))
        cap = min(cap, Np)
        cap = max(n_align, (cap // n_align) * n_align)
        if Np % cap == 0:
            tn = cap
        else:
            tn = _divisor_tile(Np, cap, n_align)
            if tn is None:
                tn = cap
                needs_mask = True
    return tb, td, tn, needs_mask


def ave_pooling(x):
    """Average-pool over the node axis: (B, N, D) -> (B, D) float32."""
    B, N, D = x.shape
    itemsize = jnp.dtype(x.dtype).itemsize

    # Lane packing for narrow features: fold g = 128 // D node rows into the lane
    # dim (free, contiguous reshape) so tiles are lane-dense rather than padding.
    g = 1
    if D < 128 and 128 % D == 0 and N % (128 // D) == 0:
        g = 128 // D
    Np, Dp = N // g, D * g
    x_in = x.reshape(B, Np, Dp) if g > 1 else x

    tb, td, tn, needs_mask = _choose_tiles(B, Np, Dp, itemsize)
    sub = 8 if (tn >= 8 and tn % 8 == 0) else tn          # sublane-group height
    d_out = D if g > 1 else td                            # output feature tile

    grid = (pl.cdiv(B, tb), pl.cdiv(Dp, td), pl.cdiv(Np, tn))   # reduction axis last

    kernel = functools.partial(
        _ave_pool_kernel, inv_n=float(1.0 / N), n_total=Np, tn=tn, sub=sub, g=g,
        d_out=d_out, needs_mask=needs_mask)

    return pl.pallas_call(
        kernel,
        out_shape=jax.ShapeDtypeStruct((B, D), jnp.float32),
        grid=grid,
        # Optional v7x knob: pipeline_mode=pl.Buffered(3) if xprof shows exposed DMA.
        in_specs=[pl.BlockSpec((tb, tn, td), lambda i, j, k: (i, k, j))],
        out_specs=pl.BlockSpec((tb, d_out), lambda i, j, k: (i, j)),
        scratch_shapes=[pltpu.VMEM((tb, sub, td), jnp.float32)],
        compiler_params=pltpu.CompilerParams(
            # Batch and feature blocks shard across TensorCores (v7x megacore);
            # the N-reduction axis carries the accumulator and stays sequential.
            dimension_semantics=("parallel", "parallel", "arbitrary"),
            vmem_limit_bytes=_VMEM_LIMIT_BYTES,
        ),
    )(x_in)


if __name__ == "__main__":
    key = jax.random.PRNGKey(0)

    # Primary shape: (batch, nodes, features) as implied by the module's forward.
    B, N, D = 2, 8, 32
    x = jax.random.normal(key, (B, N, D), dtype=jnp.float32)
    out = ave_pooling(x)
    jax.block_until_ready(out)
    ref = jnp.mean(x.astype(jnp.float32), axis=1)
    assert out.shape == (B, D)
    assert out.dtype == jnp.float32
    assert jnp.allclose(out, ref, atol=1e-5, rtol=1e-5)

    # Awkward shape: exercises the un-packed path, the cdiv reduction grid and the
    # in-kernel ragged-tail mask (prime N, B not a multiple of 8).
    B2, N2, D2 = 3, 23, 32
    x2 = jax.random.normal(jax.random.PRNGKey(1), (B2, N2, D2), dtype=jnp.float32)
    out2 = ave_pooling(x2)
    jax.block_until_ready(out2)
    ref2 = jnp.mean(x2.astype(jnp.float32), axis=1)
    assert jnp.allclose(out2, ref2, atol=1e-5, rtol=1e-5)

    print("KERNEL_OK")
</pallas_src>

<mosaic_0001>
module attributes {stable_mosaic.version = 11 : i64} {
  func.func @_ave_pool_kernel(%arg0: i32, %arg1: i32, %arg2: i32, %arg3: memref<2x2x128xf32, #tpu.memory_space<vmem>>, %arg4: memref<2x32xf32, #tpu.memory_space<vmem>>, %arg5: memref<2x2x128xf32, #tpu.memory_space<vmem>>) attributes {dimension_semantics = [#tpu.dimension_semantics<parallel>, #tpu.dimension_semantics<parallel>, #tpu.dimension_semantics<arbitrary>], iteration_bounds = array<i64: 1, 1, 1>, scalar_prefetch = 0 : i64, scratch_operands = 1 : i64, tpu.core_type = #tpu.core_type<tc>, window_params = [{transform_indices = @transform_0, window_bounds = array<i64: 2, 2, 128>}, {transform_indices = @transform_1, window_bounds = array<i64: 2, 32>}]} {
    %c0_i32 = arith.constant 0 : i32
    %0 = arith.cmpi eq, %arg2, %c0_i32 : i32
    %1 = arith.extui %0 : i1 to i32
    %c0_i32_0 = arith.constant 0 : i32
    %2 = arith.cmpi ne, %1, %c0_i32_0 : i32
    scf.if %2 {
      %cst = arith.constant 0.000000e+00 : f32
      %10 = vector.broadcast %cst : f32 to vector<2x2x128xf32>
      %c0_11 = arith.constant 0 : index
      %c0_12 = arith.constant 0 : index
      %c0_13 = arith.constant 0 : index
      %11 = vector.load %arg5[%c0_11, %c0_12, %c0_13] : memref<2x2x128xf32, #tpu.memory_space<vmem>>, vector<2x2x128xf32>
      tpu.vector_store %arg5[%c0_11, %c0_12, %c0_13], %10 {strides = array<i32>} : memref<2x2x128xf32, #tpu.memory_space<vmem>>, vector<2x2x128xf32>,
    } else {
    }
    %c0 = arith.constant 0 : index
    %c0_1 = arith.constant 0 : index
    %c0_2 = arith.constant 0 : index
    %3 = vector.load %arg3[%c0, %c0_1, %c0_2] : memref<2x2x128xf32, #tpu.memory_space<vmem>>, vector<2x2x128xf32>
    %c0_3 = arith.constant 0 : index
    %c0_4 = arith.constant 0 : index
    %c0_5 = arith.constant 0 : index
    %4 = vector.load %arg5[%c0_3, %c0_4, %c0_5] : memref<2x2x128xf32, #tpu.memory_space<vmem>>, vector<2x2x128xf32>
    %5 = arith.addf %4, %3 : vector<2x2x128xf32>
    %c0_6 = arith.constant 0 : index
    %c0_7 = arith.constant 0 : index
    %c0_8 = arith.constant 0 : index
    %6 = vector.load %arg5[%c0_6, %c0_7, %c0_8] : memref<2x2x128xf32, #tpu.memory_space<vmem>>, vector<2x2x128xf32>
    tpu.vector_store %arg5[%c0_6, %c0_7, %c0_8], %5 {strides = array<i32>} : memref<2x2x128xf32, #tpu.memory_space<vmem>>, vector<2x2x128xf32>,
    %c0_i32_9 = arith.constant 0 : i32
    %7 = arith.cmpi eq, %arg2, %c0_i32_9 : i32
    %8 = arith.extui %7 : i1 to i32
    %c0_i32_10 = arith.constant 0 : i32
    %9 = arith.cmpi ne, %8, %c0_i32_10 : i32
    scf.if %9 {
      %c0_11 = arith.constant 0 : index
      %c0_12 = arith.constant 0 : index
      %c0_13 = arith.constant 0 : index
      %10 = vector.load %arg5[%c0_11, %c0_12, %c0_13] : memref<2x2x128xf32, #tpu.memory_space<vmem>>, vector<2x2x128xf32>
      %cst = arith.constant dense<0.000000e+00> : vector<2x128xf32>
      %11 = vector.multi_reduction <add>, %10, %cst [1] : vector<2x2x128xf32> to vector<2x128xf32>
      %12 = vector.extract_strided_slice %11 {offsets = [0, 0], sizes = [2, 32], strides = [1, 1]} : vector<2x128xf32> to vector<2x32xf32>
      %13 = vector.extract_strided_slice %11 {offsets = [0, 32], sizes = [2, 32], strides = [1, 1]} : vector<2x128xf32> to vector<2x32xf32>
      %14 = arith.addf %12, %13 : vector<2x32xf32>
      %15 = vector.extract_strided_slice %11 {offsets = [0, 64], sizes = [2, 32], strides = [1, 1]} : vector<2x128xf32> to vector<2x32xf32>
      %16 = arith.addf %14, %15 : vector<2x32xf32>
      %17 = vector.extract_strided_slice %11 {offsets = [0, 96], sizes = [2, 32], strides = [1, 1]} : vector<2x128xf32> to vector<2x32xf32>
      %18 = arith.addf %16, %17 : vector<2x32xf32>
      %cst_14 = arith.constant 1.250000e-01 : f32
      %19 = vector.broadcast %cst_14 : f32 to vector<2x32xf32>
      %20 = arith.mulf %18, %19 : vector<2x32xf32>
      %c0_15 = arith.constant 0 : index
      %c0_16 = arith.constant 0 : index
      %21 = vector.load %arg4[%c0_15, %c0_16] : memref<2x32xf32, #tpu.memory_space<vmem>>, vector<2x32xf32>
      tpu.vector_store %arg4[%c0_15, %c0_16], %20 {strides = array<i32>} : memref<2x32xf32, #tpu.memory_space<vmem>>, vector<2x32xf32>,
    } else {
    }
    return
  }
  func.func @transform_0(%arg0: i32, %arg1: i32, %arg2: i32) -> (i32, i32, i32) {
    %c0_i32 = arith.constant 0 : i32
    return %arg0, %arg2, %arg1 : i32, i32, i32
  }
  func.func @transform_1(%arg0: i32, %arg1: i32, %arg2: i32) -> (i32, i32) {
    %c0_i32 = arith.constant 0 : i32
    return %arg0, %arg1 : i32, i32
  }
}

</mosaic_0001>

<bundles_post_ra>
// kernel: tpu_custom_call.1
= control target key start
LH: loop header
LB: loop body
LE: loop exit
PB: predicated region body
PF: predicated region fallthrough
CT: control target
= control target key end

     0   :  { %6 = vsyncpa [#allocation4], 0  ;;  %s198_s0 = inlined_call_operand.hbm [shape: f32[2,2,128], index: 0, kind: input, shape index: {}]   ;;  %s199_s1 = inlined_call_operand.hbm [shape: f32[2,32], index: 1, kind: output, shape index: {}]  }
   0x1   :  { %7 = vsyncpa [#allocation5], 0  ;;  %s12_s8 = sshll.u32 %s198_s0, 4  ;;  %s171_s9 = smov [#allocation3]   ;;  %s13_s8 = int_to_ptr.hbm [resolvable:$true] %s12_s8 }
   0x2   :  { %s14_s10 = sshll.u32 %s171_s9, 4  ;;  %s172_s11 = smov 32   ;;  %s15_s10 = int_to_ptr.vmem [resolvable:$true] %s14_s10 }
   0x3   :  { %s173_s12 = smov 2  }
   0x4   :  { %20 = dma.hbm_to_vmem [thread:$0]  %s13_s8, 64, %s15_s10, [#allocation4], %s172_s11, %s172_s11, %s173_s12  }
   0x5   :  { %167 = dma.done.wait [#allocation4], 64  }
   0x6   :  { %168 = vsyncadd [#allocation4], 4294967232  ;;  %v174_v0 = vmov 0.0   ;;  %v31_v1 = vld [vmem:[#allocation3] sm:$0x3]  ;;  %vm44_vm0 = vcmask 1041408  }
   0x7   :  { %29 = vst [vmem:[#allocation2] sm:$0x3] %v174_v0  ;;  %v32_v2 = vld [vmem:[#allocation3 + $0x2] sm:$0x3]  ;;  %s175_s0 = smov 96   ;;  %s176_s13 = smov 64  }
   0x8   :  { %30 = vst [vmem:[#allocation2 + $0x2] sm:$0x3] %v174_v0  ;;  %s177_s14 = smov [#allocation6]   ;;  %s102_s18 = sshll.u32 %s199_s1, 4  ;;  %vm90_vm1 = vcmask 1041409   ;;  %vm93_vm2 = vcmask 254976   ;;  %s103_s18 = int_to_ptr.hbm [resolvable:$true] %s102_s18 }
   0x9   :  { %s100_s15 = sshll.u32 %s177_s14, 4  ;;  %s101_s15 = int_to_ptr.vmem [resolvable:$true] %s100_s15 }
   0xe   :  { %v33_v3 = vld [vmem:[#allocation2] sm:$0x3] }
   0xf   :  { %v34_v4 = vld [vmem:[#allocation2 + $0x2] sm:$0x3]  ;;  %v35_v5 = vadd.f32 %v33_v3, %v31_v1 }
  0x10   :  { %v36_v6 = vadd.f32 %v34_v4, %v32_v2 }
  0x11   :  { %37 = vst [vmem:[#allocation2] sm:$0x3] %v35_v5 }
  0x12   :  { %38 = vst [vmem:[#allocation2 + $0x2] sm:$0x3] %v36_v6 }
  0x18   :  { %v42_v7 = vld [vmem:[#allocation2] sm:$0x3] }
  0x19   :  { %v43_v8 = vld [vmem:[#allocation2 + $0x2] sm:$0x3]  ;;  %v45_v9 = vsel %vm44_vm0, %v42_v7, 0.0 }
  0x1a   :  { %v52_v10 = vsel %vm44_vm0, %v43_v8, 0.0  ;;  %v46_v11 = vrot.slane %v45_v9, 4 }
  0x1b   :  { %v53_v12 = vrot.slane %v52_v10, 4 }
  0x1c   :  { %v47_v13 = vadd.f32 %v46_v11, %v45_v9 }
  0x1d   :  { %v54_v14 = vadd.f32 %v53_v12, %v52_v10 }
  0x1e   :  { %v48_v16 = vrot.slane %v47_v13, 2 }
  0x1f   :  { %v55_v15 = vrot.slane %v54_v14, 2 }
  0x20   :  { %v49_v19 = vadd.f32 %v48_v16, %v47_v13 }
  0x21   :  { %v56_v17 = vadd.f32 %v55_v15, %v54_v14 }
  0x22   :  { %v50_v21 = vrot.slane %v49_v19, 1 }
  0x23   :  { %v57_v18 = vrot.slane %v56_v17, 1 }
  0x24   :  { %v51_v22 = vadd.f32 %v50_v21, %v49_v19 }
  0x25   :  { %v58_v20 = vadd.f32 %v57_v18, %v56_v17 }
  0x27   :  { %63 = vrot.lane.b32.xlu0 %v58_v20, %s175_s0  ;;  %71 = vrot.lane.b32.xlu1 %v58_v20, %s176_s13 }
  0x28   :  { %79 = vrot.lane.b32.xlu2 %v58_v20, %s172_s11 }
  0x2f   :  { %61 = vrot.lane.b32.xlu0 %v51_v22, %s175_s0  ;;  %69 = vrot.lane.b32.xlu1 %v51_v22, %s176_s13 }
  0x30   :  { %77 = vrot.lane.b32.xlu2 %v51_v22, %s172_s11 }
  0x82   :  { %v80_v23 = vpop.permute.xlu2 %79 }
  0x8a   :  { %v78_v32 = vpop.permute.xlu2 %77 }
  0x99   :  { %v64_v24 = vpop.permute.xlu0 %63  ;;  %v72_v25 = vpop.permute.xlu1 %71 }
  0x9a   :  { %v68_v26 = vadd.f32 %v64_v24, %v58_v20 }
  0x9c   :  { %v76_v27 = vadd.f32 %v72_v25, %v68_v26 }
  0x9e   :  { %v84_v28 = vadd.f32 %v80_v23, %v76_v27 }
  0xa0   :  { %v86_v33 = vmul.f32 0.125, %v84_v28 }
  0xa1   :  { %v62_v29 = vpop.permute.xlu0 %61  ;;  %v70_v30 = vpop.permute.xlu1 %69 }
  0xa2   :  { %v67_v31 = vadd.f32 %v62_v29, %v51_v22  ;;  %v89_v36 = vrot.slane %v86_v33, 7 }
  0xa4   :  { %v75_v34 = vadd.f32 %v70_v30, %v67_v31 }
  0xa6   :  { %v83_v35 = vadd.f32 %v78_v32, %v75_v34 }
  0xa8   :  { %v85_v37 = vmul.f32 0.125, %v83_v35 }
  0xaa   :  { %v91_v38 = vsel %vm90_vm1, %v89_v36, %v85_v37 }
  0xab   :  { %94 = vst.msk [vmem:[#allocation6] sm:$0x3] %vm93_vm2, %v91_v38 }
  0xac   :  { %105 = dma.vmem_to_hbm [thread:$0]  %s101_s15, 32, %s103_s18, [#allocation5]  }
  0xad   :  { %169 = dma.done.wait [#allocation5], 32  }
  0xae   :  { %170 = vsyncadd [#allocation5], 4294967264 }
  0xaf   :  { %110 = vsyncpa [#allocation4], 1 }
  0xb0   :  { %111 = vsyncpa [#allocation5], 1 }

</bundles_post_ra>
